<compile_context>
chip_gen: v7x
topology: tpu7x:2x2x1
jax: 0.10.0
libtpu: 0.0.40
codegen_flags: <defaults>
</compile_context>

<pallas_src>
import jax
import jax.numpy as jnp
import numpy as np
from jax.experimental import pallas as pl
from jax.experimental.pallas import tpu as pltpu

# Targets of the original competition head (module references module-level
# globals N_Q_TARGETS / N_A_TARGETS).
N_Q_TARGETS = 21
N_A_TARGETS = 9


def _gelu_sig(x):
    # x * sigmoid(1.702 * x), computed in f32.
    return x * jax.nn.sigmoid(1.702 * x)


# --------------------------------------------------------------------------
# Kernel: two fused matmuls per batch tile.
# --------------------------------------------------------------------------
def head_kernel(x_ref, w1_ref, b1_ref, w2_ref, b2_ref, out_ref):
    # First fused layer: [h_q | h_a | h_x] = GELU(x_cat @ W1 + b1)   (f32 acc)
    h = jnp.dot(x_ref[...], w1_ref[...], preferred_element_type=jnp.float32)
    h = _gelu_sig(h + b1_ref[...])                      # f32 elementwise (v5e-safe)

    # Second fused layer: [out_q | out_a | 0-pad] = h @ W2 + b2
    h = h.astype(w2_ref.dtype)                          # back to MXU dtype
    out = jnp.dot(h, w2_ref[...], preferred_element_type=jnp.float32)
    out = out + b2_ref[...]

    # Single lane-dense (128-wide) store.
    out_ref[...] = out.astype(out_ref.dtype)


# --------------------------------------------------------------------------
# Wrapper
# --------------------------------------------------------------------------
def _round_up(x, m):
    return ((x + m - 1) // m) * m


def _fuse_params(params, n_feats, n_bert, n_h, n_out_pad, compute_dtype):
    """Build the two fused block weights (done once, at trace time, in XLA)."""
    f32 = jnp.float32
    zq = jnp.zeros((n_bert, n_h), f32)
    za = jnp.zeros((n_bert, n_h), f32)

    # Columns of W1 correspond to [h_q | h_a | h_x].
    col_q = jnp.concatenate([params["wq_f"], params["wq_b"], zq], axis=0)
    col_a = jnp.concatenate([params["wa_f"], za, params["wa_b"]], axis=0)
    col_x = jnp.concatenate([params["wx_f"], params["wx_q"], params["wx_a"]], axis=0)
    w1 = jnp.concatenate([col_q, col_a, col_x], axis=1)          # (n_in, 3*n_h)
    b1 = jnp.concatenate([params["bq"], params["ba"], params["bx"]], axis=1)

    # Rows of W2 correspond to [h_q ; h_a ; h_x]; columns to [out_q | out_a].
    row_q = jnp.concatenate(
        [params["whq_q"], jnp.zeros((n_h, N_A_TARGETS), f32)], axis=1)
    row_a = jnp.concatenate(
        [jnp.zeros((n_h, N_Q_TARGETS), f32), params["wha_a"]], axis=1)
    row_x = jnp.concatenate([params["whq_x"], params["wha_x"]], axis=1)
    w2 = jnp.concatenate([row_q, row_a, row_x], axis=0)          # (3*n_h, n_out)
    b2 = jnp.concatenate([params["bhq"], params["bha"]], axis=1)

    # Pad the output lane dim to a multiple of 128 so the kernel's store is
    # unmasked / lane-dense.
    n_out = N_Q_TARGETS + N_A_TARGETS
    pad = n_out_pad - n_out
    w2 = jnp.pad(w2, ((0, 0), (0, pad)))
    b2 = jnp.pad(b2, ((0, 0), (0, pad)))

    return (
        w1.astype(compute_dtype),
        b1.astype(jnp.float32),          # biases stay f32 (added to f32 acc)
        w2.astype(compute_dtype),
        b2.astype(jnp.float32),
    )


def head_forward(x_feats, x_q_bert, x_a_bert, params, *,
                 batch_tile=None, compute_dtype=jnp.bfloat16):
    B, n_feats = x_feats.shape
    n_bert = x_q_bert.shape[1]
    n_h = params["wq_f"].shape[1]
    n_in = n_feats + 2 * n_bert
    n_hid = 3 * n_h
    n_out = N_Q_TARGETS + N_A_TARGETS
    n_out_pad = _round_up(n_out, 128)

    # Pick a large batch tile: whole batch when small, 512-row tiles otherwise
    # (keeps >=2 grid steps on big batches so v7x megacore sees work).
    if batch_tile is None:
        batch_tile = B if B <= 512 else 512
    assert B % batch_tile == 0, "B must be divisible by batch_tile"
    grid = (B // batch_tile,)

    # Fused operands (built once in the wrapper).
    w1, b1, w2, b2 = _fuse_params(params, n_feats, n_bert, n_h,
                                  n_out_pad, compute_dtype)
    x_cat = jnp.concatenate([x_feats, x_q_bert, x_a_bert],
                            axis=1).astype(compute_dtype)

    def rep_spec(shape):
        return pl.BlockSpec(shape, lambda i: (0, 0))

    in_specs = [
        pl.BlockSpec((batch_tile, n_in), lambda i: (i, 0)),   # x_cat
        rep_spec((n_in, n_hid)),                              # W1
        rep_spec((1, n_hid)),                                 # b1
        rep_spec((n_hid, n_out_pad)),                         # W2
        rep_spec((1, n_out_pad)),                             # b2
    ]
    out_spec = pl.BlockSpec((batch_tile, n_out_pad), lambda i: (i, 0))

    fn = pl.pallas_call(
        head_kernel,
        out_shape=jax.ShapeDtypeStruct((B, n_out_pad), jnp.float32),
        grid_spec=pltpu.PrefetchScalarGridSpec(
            num_scalar_prefetch=0,
            grid=grid,
            in_specs=in_specs,
            out_specs=out_spec,
        ),
        compiler_params=pltpu.CompilerParams(
            dimension_semantics=("parallel",),
        ),
    )

    out_padded = fn(x_cat, w1, b1, w2, b2)
    return out_padded[:, :n_out]


# --------------------------------------------------------------------------
# Pure-JAX reference mirroring the PyTorch forward (eval mode, f32).
# --------------------------------------------------------------------------
def head_reference(x_feats, x_q_bert, x_a_bert, params):
    def lin(x, w, b):
        return _gelu_sig(x @ w + b)

    x_q_in = jnp.concatenate([x_feats, x_q_bert], axis=1)
    x_a_in = jnp.concatenate([x_feats, x_a_bert], axis=1)
    x_in = jnp.concatenate([x_feats, x_q_bert, x_a_bert], axis=1)

    wq = jnp.concatenate([params["wq_f"], params["wq_b"]], axis=0)
    wa = jnp.concatenate([params["wa_f"], params["wa_b"]], axis=0)
    wx = jnp.concatenate([params["wx_f"], params["wx_q"], params["wx_a"]], axis=0)

    x_q = lin(x_q_in, wq, params["bq"])
    x_a = lin(x_a_in, wa, params["ba"])
    x = lin(x_in, wx, params["bx"])

    whq = jnp.concatenate([params["whq_x"], params["whq_q"]], axis=0)
    wha = jnp.concatenate([params["wha_x"], params["wha_a"]], axis=0)

    out_q = jnp.concatenate([x, x_q], axis=1) @ whq + params["bhq"]
    out_a = jnp.concatenate([x, x_a], axis=1) @ wha + params["bha"]
    return jnp.concatenate([out_q, out_a], axis=1)


def init_params(key, n_feats, n_bert, n_h):
    """Deterministic synthetic parameters (not a checkpoint load)."""
    ks = jax.random.split(key, 16)
    s = 0.05
    return {
        "wq_f": jax.random.normal(ks[0], (n_feats, n_h), jnp.float32) * s,
        "wq_b": jax.random.normal(ks[1], (n_bert, n_h), jnp.float32) * s,
        "bq": jax.random.normal(ks[2], (1, n_h), jnp.float32) * s,
        "wa_f": jax.random.normal(ks[3], (n_feats, n_h), jnp.float32) * s,
        "wa_b": jax.random.normal(ks[4], (n_bert, n_h), jnp.float32) * s,
        "ba": jax.random.normal(ks[5], (1, n_h), jnp.float32) * s,
        "wx_f": jax.random.normal(ks[6], (n_feats, n_h), jnp.float32) * s,
        "wx_q": jax.random.normal(ks[7], (n_bert, n_h), jnp.float32) * s,
        "wx_a": jax.random.normal(ks[8], (n_bert, n_h), jnp.float32) * s,
        "bx": jax.random.normal(ks[9], (1, n_h), jnp.float32) * s,
        "whq_x": jax.random.normal(ks[10], (n_h, N_Q_TARGETS), jnp.float32) * s,
        "whq_q": jax.random.normal(ks[11], (n_h, N_Q_TARGETS), jnp.float32) * s,
        "bhq": jax.random.normal(ks[12], (1, N_Q_TARGETS), jnp.float32) * s,
        "wha_x": jax.random.normal(ks[13], (n_h, N_A_TARGETS), jnp.float32) * s,
        "wha_a": jax.random.normal(ks[14], (n_h, N_A_TARGETS), jnp.float32) * s,
        "bha": jax.random.normal(ks[15], (1, N_A_TARGETS), jnp.float32) * s,
    }


if __name__ == "__main__":
    # Small shapes consistent with the module's forward:
    #   x_feats: [B, n_feats], x_q_bert: [B, n_bert], x_a_bert: [B, n_bert]
    B, n_feats, n_bert, n_h = 16, 6, 32, 32

    key = jax.random.PRNGKey(0)
    k_xf, k_xq, k_xa, k_p = jax.random.split(key, 4)

    x_feats = jax.random.normal(k_xf, (B, n_feats), jnp.float32)
    x_q_bert = jax.random.normal(k_xq, (B, n_bert), jnp.float32)
    x_a_bert = jax.random.normal(k_xa, (B, n_bert), jnp.float32)
    params = init_params(k_p, n_feats, n_bert, n_h)

    ref = head_reference(x_feats, x_q_bert, x_a_bert, params)

    # f32 operands: bit-for-bit-ish vs. the reference.
    out_f32 = head_forward(x_feats, x_q_bert, x_a_bert, params,
                           compute_dtype=jnp.float32)
    out_f32 = jax.block_until_ready(out_f32)
    np.testing.assert_allclose(np.asarray(out_f32), np.asarray(ref),
                               rtol=1e-4, atol=1e-4)

    # bf16 operands (default, MXU-native): looser tolerance.
    out_bf16 = head_forward(x_feats, x_q_bert, x_a_bert, params,
                            compute_dtype=jnp.bfloat16)
    out_bf16 = jax.block_until_ready(out_bf16)
    np.testing.assert_allclose(np.asarray(out_bf16), np.asarray(ref),
                               rtol=2e-2, atol=2e-2)

    assert out_bf16.shape == (B, N_Q_TARGETS + N_A_TARGETS)
    print("KERNEL_OK")
</pallas_src>

<mosaic_0001>
module attributes {stable_mosaic.version = 11 : i64} {
  func.func @head_kernel(%arg0: i32, %arg1: memref<16x70xf32, #tpu.memory_space<vmem>>, %arg2: memref<70x96xf32, #tpu.memory_space<vmem>>, %arg3: memref<1x96xf32, #tpu.memory_space<vmem>>, %arg4: memref<96x128xf32, #tpu.memory_space<vmem>>, %arg5: memref<1x128xf32, #tpu.memory_space<vmem>>, %arg6: memref<16x128xf32, #tpu.memory_space<vmem>>) attributes {dimension_semantics = [#tpu.dimension_semantics<parallel>], iteration_bounds = array<i64: 1>, scalar_prefetch = 0 : i64, scratch_operands = 0 : i64, tpu.core_type = #tpu.core_type<tc>, window_params = [{transform_indices = @transform_0, window_bounds = array<i64: 16, 70>}, {pipeline_mode = #tpu.pipeline_mode<synchronous>, transform_indices = @transform_1, window_bounds = array<i64: 70, 96>}, {pipeline_mode = #tpu.pipeline_mode<synchronous>, transform_indices = @transform_2, window_bounds = array<i64: 1, 96>}, {pipeline_mode = #tpu.pipeline_mode<synchronous>, transform_indices = @transform_3, window_bounds = array<i64: 96, 128>}, {pipeline_mode = #tpu.pipeline_mode<synchronous>, transform_indices = @transform_4, window_bounds = array<i64: 1, 128>}, {transform_indices = @transform_5, window_bounds = array<i64: 16, 128>}]} {
    %c0 = arith.constant 0 : index
    %c0_0 = arith.constant 0 : index
    %0 = vector.load %arg1[%c0, %c0_0] : memref<16x70xf32, #tpu.memory_space<vmem>>, vector<16x70xf32>
    %c0_1 = arith.constant 0 : index
    %c0_2 = arith.constant 0 : index
    %1 = vector.load %arg2[%c0_1, %c0_2] : memref<70x96xf32, #tpu.memory_space<vmem>>, vector<70x96xf32>
    %cst = arith.constant dense<0.000000e+00> : vector<16x96xf32>
    %2 = tpu.matmul %0, %1, %cst {dimension_numbers = #tpu.dot_dimension_numbers<[1], [0], [0], [1], [0, 0, 1, 1], [], []>} : vector<16x70xf32>, vector<70x96xf32>, vector<16x96xf32> -> vector<16x96xf32>
    %c0_3 = arith.constant 0 : index
    %c0_4 = arith.constant 0 : index
    %3 = vector.load %arg3[%c0_3, %c0_4] : memref<1x96xf32, #tpu.memory_space<vmem>>, vector<1x96xf32>
    %4 = vector.broadcast %3 : vector<1x96xf32> to vector<16x96xf32>
    %5 = arith.addf %2, %4 : vector<16x96xf32>
    %cst_5 = arith.constant 1.702000e+00 : f32
    %6 = vector.broadcast %cst_5 : f32 to vector<16x96xf32>
    %7 = arith.mulf %6, %5 : vector<16x96xf32>
    %8 = arith.negf %7 : vector<16x96xf32>
    %9 = math.exp %8 : vector<16x96xf32>
    %cst_6 = arith.constant 1.000000e+00 : f32
    %10 = vector.broadcast %cst_6 : f32 to vector<16x96xf32>
    %11 = arith.addf %10, %9 : vector<16x96xf32>
    %12 = arith.divf %10, %11 : vector<16x96xf32>
    %13 = arith.mulf %5, %12 : vector<16x96xf32>
    %c0_7 = arith.constant 0 : index
    %c0_8 = arith.constant 0 : index
    %14 = vector.load %arg4[%c0_7, %c0_8] : memref<96x128xf32, #tpu.memory_space<vmem>>, vector<96x128xf32>
    %cst_9 = arith.constant dense<0.000000e+00> : vector<16x128xf32>
    %15 = tpu.matmul %13, %14, %cst_9 {dimension_numbers = #tpu.dot_dimension_numbers<[1], [0], [0], [1], [0, 0, 1, 1], [], []>} : vector<16x96xf32>, vector<96x128xf32>, vector<16x128xf32> -> vector<16x128xf32>
    %c0_10 = arith.constant 0 : index
    %c0_11 = arith.constant 0 : index
    %16 = vector.load %arg5[%c0_10, %c0_11] : memref<1x128xf32, #tpu.memory_space<vmem>>, vector<1x128xf32>
    %17 = vector.broadcast %16 : vector<1x128xf32> to vector<16x128xf32>
    %18 = arith.addf %15, %17 : vector<16x128xf32>
    %c0_12 = arith.constant 0 : index
    %c0_13 = arith.constant 0 : index
    %19 = vector.load %arg6[%c0_12, %c0_13] : memref<16x128xf32, #tpu.memory_space<vmem>>, vector<16x128xf32>
    tpu.vector_store %arg6[%c0_12, %c0_13], %18 {strides = array<i32>} : memref<16x128xf32, #tpu.memory_space<vmem>>, vector<16x128xf32>,
    return
  }
  func.func @transform_0(%arg0: i32) -> (i32, i32) {
    %c0_i32 = arith.constant 0 : i32
    %c0_i32_0 = arith.constant 0 : i32
    return %arg0, %c0_i32 : i32, i32
  }
  func.func @transform_1(%arg0: i32) -> (i32, i32) {
    %c0_i32 = arith.constant 0 : i32
    %c0_i32_0 = arith.constant 0 : i32
    %c0_i32_1 = arith.constant 0 : i32
    return %c0_i32, %c0_i32_0 : i32, i32
  }
  func.func @transform_2(%arg0: i32) -> (i32, i32) {
    %c0_i32 = arith.constant 0 : i32
    %c0_i32_0 = arith.constant 0 : i32
    %c0_i32_1 = arith.constant 0 : i32
    return %c0_i32, %c0_i32_0 : i32, i32
  }
  func.func @transform_3(%arg0: i32) -> (i32, i32) {
    %c0_i32 = arith.constant 0 : i32
    %c0_i32_0 = arith.constant 0 : i32
    %c0_i32_1 = arith.constant 0 : i32
    return %c0_i32, %c0_i32_0 : i32, i32
  }
  func.func @transform_4(%arg0: i32) -> (i32, i32) {
    %c0_i32 = arith.constant 0 : i32
    %c0_i32_0 = arith.constant 0 : i32
    %c0_i32_1 = arith.constant 0 : i32
    return %c0_i32, %c0_i32_0 : i32, i32
  }
  func.func @transform_5(%arg0: i32) -> (i32, i32) {
    %c0_i32 = arith.constant 0 : i32
    %c0_i32_0 = arith.constant 0 : i32
    return %arg0, %c0_i32 : i32, i32
  }
}

</mosaic_0001>

<bundles_post_ra>
// kernel: tpu_custom_call.1
= control target key start
LH: loop header
LB: loop body
LE: loop exit
PB: predicated region body
PF: predicated region fallthrough
CT: control target
= control target key end

     0   :  { %10 = vsyncpa [#allocation3], 0  ;;  %s644_s0 = inlined_call_operand.hbm [shape: f32[16,70], index: 0, kind: input, shape index: {}]   ;;  %s645_s1 = inlined_call_operand.hbm [shape: f32[70,96], index: 1, kind: input, shape index: {}]   ;;  %s646_s2 = inlined_call_operand.vmem [shape: f32[1,96], index: 2, kind: input, shape index: {}]   ;;  %s647_s3 = inlined_call_operand.hbm [shape: f32[96,128], index: 3, kind: input, shape index: {}]   ;;  %s648_s4 = inlined_call_operand.vmem [shape: f32[1,128], index: 4, kind: input, shape index: {}]   ;;  %s649_s5 = inlined_call_operand.hbm [shape: f32[16,128], index: 5, kind: output, shape index: {}]  }
   0x1   :  { %11 = vsyncpa [#allocation6], 0 }
   0x2   :  { %12 = vsyncpa [#allocation4], 0  ;;  %s533_s18 = smov [#allocation5]   ;;  %s534_s20 = smov [#allocation2]  }
   0x3   :  { %s30_s19 = sshll.u32 %s533_s18, 4  ;;  %s18_s21 = sshll.u32 %s534_s20, 4  ;;  %s31_s19 = int_to_ptr.vmem [resolvable:$true] %s30_s19  ;;  %s569_s21 = int_to_ptr.vmem [resolvable:$true] %s18_s21 }
   0x4   :  { %s439_s24 = scalar_lea.hbm %s645_s1, 1152 }
   0x5   :  { %p440_p0 = scmp.ne.s32.totalorder %s645_s1, %s439_s24  ;;  %p443_p1 = scmp.lt.u32.totalorder %s439_s24, %s645_s1 }
   0x7   :  { %p445_p2 = pnand %p443_p1, %p440_p0 }
   0x9   :  { %448 = shalt.err (!%p445_p2)
}
   0xa   :  { %s449_s29 = scalar_lea.vmem %s31_s19, 1152  ;;  %p454_p4 = scmp.lt.s32.totalorder %s31_s19, %s31_s19 }
   0xb   :  { %p450_p3 = scmp.ne.s32.totalorder %s31_s19, %s449_s29  ;;  %p455_p5 = scmp.lt.s32.totalorder %s449_s29, %s449_s29 }
   0xd   :  { %p456_p6 = por %p455_p5, %p454_p4 }
   0xf   :  { %p457_p7 = pnand %p456_p6, %p450_p3 }
  0x11   :  { %460 = shalt.err (!%p457_p7)
}
  0x12   :  { %s535_s30 = smov 128   ;;  %s536_s6 = smov 8  }
  0x13   :  { %36 = dma.hbm_to_vmem [thread:$0]  %s645_s1, 1152, %s31_s19, [#allocation6], %s535_s30, %s535_s30, %s536_s6  }
  0x14   :  { %s461_s11 = scalar_lea.hbm %s644_s0, 256 }
  0x15   :  { %p462_p8 = scmp.ne.s32.totalorder %s644_s0, %s461_s11  ;;  %p465_p9 = scmp.lt.u32.totalorder %s461_s11, %s644_s0 }
  0x17   :  { %p467_p10 = pnand %p465_p9, %p462_p8 }
  0x19   :  { %470 = shalt.err (!%p467_p10)
}
  0x1a   :  { %s471_s16 = scalar_lea.vmem %s569_s21, 256  ;;  %p476_p12 = scmp.lt.s32.totalorder %s569_s21, %s569_s21 }
  0x1b   :  { %p472_p11 = scmp.ne.s32.totalorder %s569_s21, %s471_s16  ;;  %p477_p13 = scmp.lt.s32.totalorder %s471_s16, %s471_s16 }
  0x1d   :  { %p478_p0 = por %p477_p13, %p476_p12 }
  0x1f   :  { %p479_p1 = pnand %p478_p0, %p472_p11 }
  0x21   :  { %482 = shalt.err (!%p479_p1)
}
  0x22   :  { %24 = dma.hbm_to_vmem [thread:$0]  %s644_s0, 256, %s569_s21, [#allocation3], %s535_s30, %s535_s30, %s536_s6  }
  0x23   :  { %s537_s18 = smov [#allocation7]   ;;  %s483_s23 = scalar_lea.hbm %s647_s3, 1536 }
  0x24   :  { %s44_s19 = sshll.u32 %s537_s18, 4  ;;  %p484_p2 = scmp.ne.s32.totalorder %s647_s3, %s483_s23  ;;  %s45_s19 = int_to_ptr.vmem [resolvable:$true] %s44_s19 }
  0x25   :  { %p487_p3 = scmp.lt.u32.totalorder %s483_s23, %s647_s3 }
  0x27   :  { %p489_p4 = pnand %p487_p3, %p484_p2 }
  0x29   :  { %492 = shalt.err (!%p489_p4)
}
  0x2a   :  { %s493_s28 = scalar_lea.vmem %s45_s19, 1536  ;;  %p498_p6 = scmp.lt.s32.totalorder %s45_s19, %s45_s19 }
  0x2b   :  { %p494_p5 = scmp.ne.s32.totalorder %s45_s19, %s493_s28  ;;  %p499_p7 = scmp.lt.s32.totalorder %s493_s28, %s493_s28 }
  0x2d   :  { %p500_p8 = por %p499_p7, %p498_p6 }
  0x2f   :  { %p501_p9 = pnand %p500_p8, %p494_p5 }
  0x31   :  { %504 = shalt.err (!%p501_p9)
}
  0x32   :  { %50 = dma.hbm_to_vmem [thread:$0]  %s647_s3, 1536, %s45_s19, [#allocation6], %s535_s30, %s535_s30, %s536_s6  }
  0x33   :  { %527 = dma.done.wait [#allocation3], 256  }
  0x34   :  { %528 = vsyncadd [#allocation3], 4294967040 }
  0x35   :  { %529 = dma.done.wait [#allocation6], 2688  }
  0x36   :  { %530 = vsyncadd [#allocation6], 4294964608  ;;  %v64_v0 = vld [vmem:[#allocation5] sm:$0xff]  ;;  %v65_v1 = vld [vmem:[#allocation5 + $0x8] sm:$0xff]  ;;  %vm80_vm0 = vcmask 572416   ;;  %vm87_vm1 = vcmask 1045504  }
  0x37   :  { %v66_v2 = vld [vmem:[#allocation5 + $0x10] sm:$0xff]  ;;  %v385_v3 = vpack.c.bf16 %v65_v1, %v64_v0  ;;  %v67_v4 = vld [vmem:[#allocation5 + $0x18] sm:$0xff]  ;;  %v68_v6 = vld [vmem:[#allocation5 + $0x20] sm:$0xff]  ;;  %vm201_vm2 = vcmask 785408   ;;  %s538_s8 = smov [#allocation8]  }
  0x38   :  { %v389_v5 = vpack.c.bf16 %v67_v4, %v66_v2  ;;  %v69_v7 = vld [vmem:[#allocation5 + $0x28] sm:$0xff]  ;;  %v62_v8 = vld [vmem:[#allocation2] sm:$0xff]  ;;  %v71_v11 = vld [vmem:[#allocation5 + $0x38] sm:$0xff]  ;;  %s290_s9 = sshll.u32 %s538_s8, 4  ;;  %s291_s9 = int_to_ptr.vmem [resolvable:$true] %s290_s9 }
  0x39   :  { %386 = vmatprep.subr.bf16.mxu0 %v385_v3  ;;  %355 = vmatprep.mubr.msk.f32.mxu0 %vm80_vm0, %v62_v8  ;;  %v393_v9 = vpack.c.bf16 %v69_v7, %v68_v6  ;;  %v70_v10 = vld [vmem:[#allocation5 + $0x30] sm:$0xff]  ;;  %v72_v13 = vld [vmem:[#allocation5 + $0x40] sm:$0x3f]  ;;  %v63_v14 = vld [vmem:[#allocation2 + $0x8] sm:$0xff]  ;;  %s505_s10 = scalar_lea.vmem %s291_s9, 256  ;;  %p510_p11 = scmp.lt.s32.totalorder %s291_s9, %s291_s9 }
  0x3a   :  { %388 = vmatpush3.bf16.msra.mxu0 %v385_v3  ;;  %v397_v12 = vpack.c.bf16 %v71_v11, %v70_v10  ;;  %v182_v15 = vld [vmem:[#allocation7] sm:$0xff]  ;;  %v183_v16 = vld [vmem:[#allocation7 + $0x8] sm:$0xff]  ;;  %v184_v18 = vld [vmem:[#allocation7 + $0x10] sm:$0xff]  ;;  %p506_p10 = scmp.ne.s32.totalorder %s291_s9, %s505_s10  ;;  %p511_p12 = scmp.lt.s32.totalorder %s505_s10, %s505_s10 }
  0x3b   :  { %390 = vmatprep.subr.bf16.mxu0 %v389_v5  ;;  %v401_v17 = vpack.c.bf16 %v183_v16, %v182_v15  ;;  %v185_v19 = vld [vmem:[#allocation7 + $0x18] sm:$0xff]  ;;  %v186_v21 = vld [vmem:[#allocation7 + $0x20] sm:$0xff]  ;;  %v187_v22 = vld [vmem:[#allocation7 + $0x28] sm:$0xff] }
  0x3c   :  { %v405_v20 = vpack.c.bf16 %v185_v19, %v184_v18  ;;  %v409_v23 = vpack.c.bf16 %v187_v22, %v186_v21  ;;  %v188_v24 = vld [vmem:[#allocation7 + $0x30] sm:$0xff]  ;;  %v189_v25 = vld [vmem:[#allocation7 + $0x38] sm:$0xff]  ;;  %v190_v27 = vld [vmem:[#allocation7 + $0x40] sm:$0xff]  ;;  %p512_p13 = por %p511_p12, %p510_p11 }
  0x3d   :  { %402 = vmatprep.subr.bf16.mxu1 %v401_v17  ;;  %v413_v26 = vpack.c.bf16 %v189_v25, %v188_v24  ;;  %v191_v28 = vld [vmem:[#allocation7 + $0x48] sm:$0xff]  ;;  %v192_v30 = vld [vmem:[#allocation7 + $0x50] sm:$0xff]  ;;  %v193_v31 = vld [vmem:[#allocation7 + $0x58] sm:$0xff] }
  0x3e   :  { %392 = vmatpush3.bf16.msra.mxu0 %v389_v5  ;;  %404 = vmatpush3.bf16.msra.mxu1 %v401_v17  ;;  %v417_v29 = vpack.c.bf16 %v191_v28, %v190_v27  ;;  %v421_v32 = vpack.c.bf16 %v193_v31, %v192_v30  ;;  %v303_v33 = vld [vmem:[%s646_s2] ss:$0 sm:$0xff]  ;;  %p513_p0 = pnand %p512_p13, %p506_p10 }
  0x3f   :  { %394 = vmatprep.subr.bf16.mxu0 %v393_v9  ;;  %406 = vmatprep.subr.bf16.mxu1 %v405_v20  ;;  %v309_v50 = vld [vmem:[%s648_s4] ss:$0 sm:$0xff] }
  0x42   :  { %396 = vmatpush3.bf16.msra.mxu0 %v393_v9  ;;  %408 = vmatpush3.bf16.msra.mxu1 %v405_v20 }
  0x43   :  { %398 = vmatprep.subr.bf16.mxu0 %v397_v12  ;;  %410 = vmatprep.subr.bf16.mxu1 %v409_v23 }
  0x46   :  { %400 = vmatpush3.bf16.msra.mxu0 %v397_v12  ;;  %412 = vmatpush3.bf16.msra.mxu1 %v409_v23 }
  0x47   :  { %353 = vmatprep.subr.msk.mxu0 %vm87_vm1, %v72_v13  ;;  %414 = vmatprep.subr.bf16.mxu1 %v413_v26 }
  0x4a   :  { %354 = vmatpush3.msk.msra.mxu0 %vm87_vm1, %v72_v13  ;;  %416 = vmatpush3.bf16.msra.mxu1 %v413_v26 }
  0x4b   :  { %356 = vmatmul.mubr.msk.f32.vlgmr.msra.gmra.mrb[0].mxu0 %vm80_vm0, %v63_v14  ;;  %418 = vmatprep.subr.bf16.mxu1 %v417_v29 }
  0x4e   :  { %420 = vmatpush3.bf16.msra.mxu1 %v417_v29 }
  0x4f   :  { %422 = vmatprep.subr.bf16.mxu1 %v421_v32 }
  0x52   :  { %424 = vmatpush3.bf16.msra.mxu1 %v421_v32 }
 0x11e   :  { %v357_v34 = vpop.f32.mrb[0].mxu0 }
 0x11f   :  { %v163_v35 = vadd.f32 %v357_v34, %v303_v33  ;;  %v157_v36 = vpop.f32.mrb[1].mxu0 }
 0x120   :  { %v158_v37 = vadd.f32 %v303_v33, %v157_v36 }
 0x121   :  { %v308_v38 = vmul.f32 -1.702, %v163_v35 }
 0x122   :  { %v307_v39 = vmul.f32 -1.702, %v158_v37 }
 0x123   :  { %v172_v40 = vmul.f32 1.442695, %v308_v38 }
 0x124   :  { %v170_v41 = vmul.f32 1.442695, %v307_v39 }
 0x125   :  { %431 = vpow2.f32 %v172_v40 }
 0x126   :  { %433 = vpow2.f32 %v170_v41 }
 0x12f   :  { %v432_v42 = vpop.eup %431 }
 0x130   :  { %v434_v43 = vpop.eup %433  ;;  %v175_v44 = vadd.f32 1.0, %v432_v42 }
 0x131   :  { %v174_v45 = vadd.f32 1.0, %v434_v43 }
 0x132   :  { %435 = vrcp.f32 %v175_v44 }
 0x133   :  { %437 = vrcp.f32 %v174_v45 }
 0x13c   :  { %v436_v46 = vpop.eup %435 }
 0x13d   :  { %v438_v47 = vpop.eup %437  ;;  %v181_v49 = vmul.f32 %v436_v46, %v163_v35 }
 0x13e   :  { %v180_v48 = vmul.f32 %v438_v47, %v158_v37 }
 0x140   :  { %382 = vmatprep.mubr.msk.f32.mxu1 %vm201_vm2, %v180_v48 }
 0x141   :  { %383 = vmatmul.mubr.msk.f32.vlgmr.msra.gmra.mrb[0].mxu1 %vm201_vm2, %v181_v49 }
 0x214   :  { %v384_v51 = vpop.f32.mrb[0].mxu1 }
 0x215   :  { %v280_v52 = vadd.f32 %v384_v51, %v309_v50  ;;  %v274_v53 = vpop.f32.mrb[1].mxu1 }
 0x216   :  { %v275_v54 = vadd.f32 %v309_v50, %v274_v53 }
 0x217   :  { %284 = vst [vmem:[#allocation8 + $0x8] sm:$0xff] %v280_v52 }
 0x218   :  { %283 = vst [vmem:[#allocation8] sm:$0xff] %v275_v54 }
 0x219   :  { %516 = shalt.err (!%p513_p0)
}
 0x21a   :  { %s517_s4 = scalar_lea.hbm %s649_s5, 256 }
 0x21b   :  { %p518_p1 = scmp.ne.s32.totalorder %s649_s5, %s517_s4  ;;  %p521_p2 = scmp.lt.u32.totalorder %s517_s4, %s649_s5 }
 0x21d   :  { %p523_p3 = pnand %p521_p2, %p518_p1 }
 0x21f   :  { %526 = shalt.err (!%p523_p3)
}
 0x220   :  { %296 = dma.vmem_to_hbm [thread:$0]  %s291_s9, 256, %s649_s5, [#allocation4], %s535_s30, %s535_s30, %s536_s6  }
 0x221   :  { %531 = dma.done.wait [#allocation4], 256  }
 0x222   :  { %532 = vsyncadd [#allocation4], 4294967040 }
 0x223   :  { %300 = vsyncpa [#allocation3], 1 }
 0x224   :  { %301 = vsyncpa [#allocation6], 1 }
 0x225   :  { %302 = vsyncpa [#allocation4], 1 }

</bundles_post_ra>
